<compile_context>
chip_gen: v6e
topology: v6e:2x2x1
jax: 0.10.0
libtpu: 0.0.40
codegen_flags: <defaults>
</compile_context>

<pallas_src>
import functools

import jax
import jax.numpy as jnp
import numpy as np
from jax.experimental import pallas as pl
from jax.experimental.pallas import tpu as pltpu


def _round_up(x, m):
    return (x + m - 1) // m * m


def _elu(x):
    # ELU(alpha=1). exp(x) - 1 keeps the lowering on the guaranteed EUP exp
    # path; the accuracy delta vs expm1 is far below the test tolerance.
    return jnp.where(x > 0, x, jnp.exp(x) - 1.0)


def _tpu_settings():
    """Per-generation knobs: (tile_l_target, taps_per_chunk, tail_in_bf16)."""
    try:
        kind = jax.devices()[0].device_kind.lower()
    except Exception:
        kind = ""
    old_gen = any(t in kind for t in ("v2", "v3", "v4", "v5"))
    if old_gen:
        # v5e & older: 128-deep MXU, no bf16 VPU/EUP, tighter vreg budget.
        return 256, 1, False
    # v6e / v7x: 256-deep MXU passes, bf16 VPU/EUP at packed rate.
    return 512, 2, True


def resnet1d_kernel(x_main_ref, x_halo_ref, w0_ref, b0_ref, w1_ref, b1_ref,
                    o_ref, xbuf_ref, *, kernel_size, dilation, tile_l,
                    halo_pad, pad, taps_per_chunk, tail_bf16):
    # x_main_ref: (1, tile_l,  Cp)  bf16   this step's main input window
    # x_halo_ref: (1, halo_pad, Cp) bf16   halo tail right after the window
    # w0_ref    : (K*Cp, Cp)        bf16   conv0 taps stacked on contraction
    # b0_ref    : (1, Cp)           f32
    # w1_ref    : (Cp, Cp)          bf16   1x1 conv weight (Cin, Cout)
    # b1_ref    : (1, Cp)           f32
    # o_ref     : (1, tile_l, Cp)   bf16
    # xbuf_ref  : (tile_l+halo_pad, Cp) bf16 VMEM scratch (stitched window)
    cp = w0_ref.shape[1]

    # Stitch main window + halo tail into one contiguous VMEM buffer so every
    # dilated tap (and the residual) is a plain ref-sliced load.
    xbuf_ref[pl.ds(0, tile_l), :] = x_main_ref[0]
    xbuf_ref[pl.ds(tile_l, halo_pad), :] = x_halo_ref[0]

    # --- conv0: K dilated taps contracted against the (K*Cp, Cp) weight slab
    # in generation-sized chunks (1 tap on v5e, 2 taps = 256-deep on v6e/v7x).
    acc = None
    for c0 in range(0, kernel_size, taps_per_chunk):
        c1 = min(c0 + taps_per_chunk, kernel_size)
        taps = [xbuf_ref[pl.ds(t * dilation, tile_l), :] for t in range(c0, c1)]
        lhs = taps[0] if len(taps) == 1 else jnp.concatenate(taps, axis=-1)
        w_chunk = w0_ref[pl.ds(c0 * cp, (c1 - c0) * cp), :]
        part = jnp.dot(lhs, w_chunk, preferred_element_type=jnp.float32)
        acc = part if acc is None else acc + part
    acc = acc + b0_ref[...]                              # f32

    # --- ELU (f32, VPU/EUP) ---
    h = _elu(acc)

    # --- conv1: 1x1 conv == channel matmul (bf16 MXU, f32 accumulate) ---
    z = jnp.dot(h.astype(w1_ref.dtype), w1_ref[...],
                preferred_element_type=jnp.float32) + b1_ref[...]

    # --- residual (crop 'valid' padding) + final ELU ---
    res = xbuf_ref[pl.ds(pad, tile_l), :]                # bf16
    if tail_bf16:
        y = _elu(z.astype(jnp.bfloat16) + res)           # bf16 VPU/EUP tail
    else:
        y = _elu(z + res.astype(jnp.float32))            # f32 tail (v5e)
    o_ref[0] = y.astype(o_ref.dtype)


@functools.partial(jax.jit, static_argnames=("kernel_size", "dilation"))
def resnet1d_pallas(x_ncl, w0, b0, w1, b1, *, kernel_size, dilation):
    """x_ncl: (B, C, L) like PyTorch. w0: (Cout, Cin, K), w1: (Cout, Cin, 1)."""
    B, C, L = x_ncl.shape
    K = kernel_size
    assert K % 2 == 1, "residual crop pad:-pad matches only for odd kernel_size"
    pad = (K // 2) * dilation
    halo = (K - 1) * dilation
    Lout = L - halo
    assert Lout > 0

    tile_target, taps_per_chunk, tail_bf16 = _tpu_settings()

    # Lane-dense channel padding, sublane-friendly halo/tile sizing.
    Cp = max(128, _round_up(C, 128))
    halo_pad = _round_up(halo, 16)                 # bf16 (16,128)-tile friendly
    tile_l = min(tile_target, _round_up(Lout, 16))
    tile_l = _round_up(tile_l, halo_pad)           # keep halo block index integral
    ratio = tile_l // halo_pad
    n_l = pl.cdiv(Lout, tile_l)
    Lout_pad = n_l * tile_l
    L_pad = Lout_pad + halo_pad                    # room for the last halo tail

    # Channels-last, zero-padded, bf16 activations (halves DMA bytes, MXU-native).
    x_nlc = jnp.transpose(x_ncl, (0, 2, 1))                       # (B, L, C)
    x_nlc = jnp.pad(x_nlc, ((0, 0), (0, L_pad - L), (0, Cp - C)))
    x_nlc = x_nlc.astype(jnp.bfloat16)                            # (B, L_pad, Cp)

    # conv0 weight (Cout, Cin, K) -> tap-major contraction slab (K*Cp, Cp):
    # row index t*Cp + cin matches the lane-concatenated LHS built in-kernel.
    w0_k = jnp.transpose(w0, (2, 1, 0))                           # (K, Cin, Cout)
    w0_k = jnp.pad(w0_k, ((0, 0), (0, Cp - C), (0, Cp - C)))
    w0_slab = w0_k.reshape(K * Cp, Cp).astype(jnp.bfloat16)

    w1_m = jnp.transpose(w1[:, :, 0], (1, 0))                     # (Cin, Cout)
    w1_m = jnp.pad(w1_m, ((0, Cp - C), (0, Cp - C))).astype(jnp.bfloat16)

    b0_r = jnp.pad(b0, (0, Cp - C)).reshape(1, Cp).astype(jnp.float32)
    b1_r = jnp.pad(b1, (0, Cp - C)).reshape(1, Cp).astype(jnp.float32)

    kern = functools.partial(
        resnet1d_kernel, kernel_size=K, dilation=dilation, tile_l=tile_l,
        halo_pad=halo_pad, pad=pad, taps_per_chunk=taps_per_chunk,
        tail_bf16=tail_bf16)

    out_nlc = pl.pallas_call(
        kern,
        out_shape=jax.ShapeDtypeStruct((B, Lout_pad, Cp), jnp.bfloat16),
        grid_spec=pltpu.PrefetchScalarGridSpec(
            num_scalar_prefetch=0,
            grid=(B, n_l),
            in_specs=[
                # Halo-windowed input: main block for this tile plus the halo
                # tail starting at element (l+1)*tile_l (= block (l+1)*ratio
                # of halo_pad-sized blocks).  Both are plain Blocked specs,
                # auto double-buffered by the pipeline.
                pl.BlockSpec((1, tile_l, Cp), lambda b, l: (b, l, 0)),
                pl.BlockSpec((1, halo_pad, Cp),
                             lambda b, l: (b, (l + 1) * ratio, 0)),
                # Weights/biases: constant block index -> DMA'd once, VMEM
                # resident across the whole grid.
                pl.BlockSpec((K * Cp, Cp), lambda b, l: (0, 0)),
                pl.BlockSpec((1, Cp), lambda b, l: (0, 0)),
                pl.BlockSpec((Cp, Cp), lambda b, l: (0, 0)),
                pl.BlockSpec((1, Cp), lambda b, l: (0, 0)),
            ],
            out_specs=pl.BlockSpec((1, tile_l, Cp), lambda b, l: (b, l, 0)),
            scratch_shapes=[pltpu.VMEM((tile_l + halo_pad, Cp), jnp.bfloat16)],
        ),
        compiler_params=pltpu.CompilerParams(
            dimension_semantics=("parallel", "parallel"),
        ),
    )(x_nlc, x_nlc, w0_slab, b0_r, w1_m, b1_r)

    # Crop length/channel padding and return PyTorch NCL layout (f32).
    return jnp.transpose(out_nlc[:, :Lout, :C], (0, 2, 1)).astype(x_ncl.dtype)


def resnet1d_reference(x_ncl, w0, b0, w1, b1, *, kernel_size, dilation):
    """Pure-JAX f32 reference mirroring the PyTorch forward (for validation)."""
    pad = (kernel_size // 2) * dilation
    dn = ("NCH", "OIH", "NCH")
    y0 = jax.lax.conv_general_dilated(
        x_ncl, w0, window_strides=(1,), padding="VALID",
        rhs_dilation=(dilation,), dimension_numbers=dn) + b0[None, :, None]
    h = jax.nn.elu(y0)
    y1 = jax.lax.conv_general_dilated(
        h, w1, window_strides=(1,), padding="VALID",
        dimension_numbers=dn) + b1[None, :, None]
    res = x_ncl[:, :, pad:-pad]
    return jax.nn.elu(y1 + res)


def _run_case(key, B, C, L, K, DIL):
    kx, kw0, kb0, kw1, kb1 = jax.random.split(key, 5)
    x = jax.random.normal(kx, (B, C, L), dtype=jnp.float32)
    w0 = 0.1 * jax.random.normal(kw0, (C, C, K), dtype=jnp.float32)   # (Cout,Cin,K)
    b0 = 0.1 * jax.random.normal(kb0, (C,), dtype=jnp.float32)
    w1 = 0.1 * jax.random.normal(kw1, (C, C, 1), dtype=jnp.float32)   # (Cout,Cin,1)
    b1 = 0.1 * jax.random.normal(kb1, (C,), dtype=jnp.float32)

    # Pre-round inputs/weights to bf16-representable values so the kernel's
    # bf16 MXU / bf16-residual path can be compared against the f32 reference;
    # the remaining divergence (bf16 intermediate + bf16 output store) is well
    # inside the 2e-2 tolerance.  For strict f32 parity one would keep an f32
    # copy of x for the residual path (doubles input traffic; not done here).
    rb = lambda a: a.astype(jnp.bfloat16).astype(jnp.float32)
    x, w0, w1 = rb(x), rb(w0), rb(w1)

    out = resnet1d_pallas(x, w0, b0, w1, b1, kernel_size=K, dilation=DIL)
    out = jax.block_until_ready(out)
    ref = resnet1d_reference(x, w0, b0, w1, b1, kernel_size=K, dilation=DIL)
    np.testing.assert_allclose(np.asarray(out), np.asarray(ref),
                               rtol=2e-2, atol=2e-2)


if __name__ == "__main__":
    key = jax.random.PRNGKey(0)
    k1, k2 = jax.random.split(key)

    # Shapes consistent with ResNet1d(n_channels=4, kernel_size=7,
    # padding='valid', dilation=1): input (2, 4, 16) -> output (2, 4, 10).
    _run_case(k1, B=2, C=4, L=16, K=7, DIL=1)

    # Longer, dilated case exercising the multi-tile halo path.
    _run_case(k2, B=2, C=4, L=1100, K=7, DIL=3)

    print("KERNEL_OK")
</pallas_src>

<mosaic_0001>
module attributes {stable_mosaic.version = 11 : i64} {
  func.func @resnet1d_kernel(%arg0: i32, %arg1: i32, %arg2: memref<1x16x128xbf16, #tpu.memory_space<vmem>>, %arg3: memref<1x16x128xbf16, #tpu.memory_space<vmem>>, %arg4: memref<896x128xbf16, #tpu.memory_space<vmem>>, %arg5: memref<1x128xf32, #tpu.memory_space<vmem>>, %arg6: memref<128x128xbf16, #tpu.memory_space<vmem>>, %arg7: memref<1x128xf32, #tpu.memory_space<vmem>>, %arg8: memref<1x16x128xbf16, #tpu.memory_space<vmem>>, %arg9: memref<32x128xbf16, #tpu.memory_space<vmem>>) attributes {dimension_semantics = [#tpu.dimension_semantics<parallel>, #tpu.dimension_semantics<parallel>], iteration_bounds = array<i64: 2, 1>, scalar_prefetch = 0 : i64, scratch_operands = 1 : i64, tpu.core_type = #tpu.core_type<tc>, window_params = [{transform_indices = @transform_0, window_bounds = array<i64: 1, 16, 128>}, {transform_indices = @transform_1, window_bounds = array<i64: 1, 16, 128>}, {pipeline_mode = #tpu.pipeline_mode<synchronous>, transform_indices = @transform_2, window_bounds = array<i64: 896, 128>}, {pipeline_mode = #tpu.pipeline_mode<synchronous>, transform_indices = @transform_3, window_bounds = array<i64: 1, 128>}, {pipeline_mode = #tpu.pipeline_mode<synchronous>, transform_indices = @transform_4, window_bounds = array<i64: 128, 128>}, {pipeline_mode = #tpu.pipeline_mode<synchronous>, transform_indices = @transform_5, window_bounds = array<i64: 1, 128>}, {transform_indices = @transform_6, window_bounds = array<i64: 1, 16, 128>}]} {
    %c0 = arith.constant 0 : index
    %c0_0 = arith.constant 0 : index
    %c0_1 = arith.constant 0 : index
    %0 = vector.load %arg2[%c0, %c0_0, %c0_1] : memref<1x16x128xbf16, #tpu.memory_space<vmem>>, vector<1x16x128xbf16>
    %1 = vector.shape_cast %0 : vector<1x16x128xbf16> to vector<16x128xbf16>
    %c0_2 = arith.constant 0 : index
    %c0_3 = arith.constant 0 : index
    %2 = vector.load %arg9[%c0_2, %c0_3] : memref<32x128xbf16, #tpu.memory_space<vmem>>, vector<16x128xbf16>
    tpu.vector_store %arg9[%c0_2, %c0_3], %1 {strides = array<i32>} : memref<32x128xbf16, #tpu.memory_space<vmem>>, vector<16x128xbf16>,
    %c0_4 = arith.constant 0 : index
    %c0_5 = arith.constant 0 : index
    %c0_6 = arith.constant 0 : index
    %3 = vector.load %arg3[%c0_4, %c0_5, %c0_6] : memref<1x16x128xbf16, #tpu.memory_space<vmem>>, vector<1x16x128xbf16>
    %4 = vector.shape_cast %3 : vector<1x16x128xbf16> to vector<16x128xbf16>
    %c16 = arith.constant 16 : index
    %c0_7 = arith.constant 0 : index
    %5 = vector.load %arg9[%c16, %c0_7] : memref<32x128xbf16, #tpu.memory_space<vmem>>, vector<16x128xbf16>
    tpu.vector_store %arg9[%c16, %c0_7], %4 {strides = array<i32>} : memref<32x128xbf16, #tpu.memory_space<vmem>>, vector<16x128xbf16>,
    %c0_8 = arith.constant 0 : index
    %c0_9 = arith.constant 0 : index
    %6 = vector.load %arg9[%c0_8, %c0_9] : memref<32x128xbf16, #tpu.memory_space<vmem>>, vector<16x128xbf16>
    %c1 = arith.constant 1 : index
    %c0_10 = arith.constant 0 : index
    %7 = vector.load %arg9[%c1, %c0_10] : memref<32x128xbf16, #tpu.memory_space<vmem>>, vector<16x128xbf16>
    %8 = tpu.concatenate %6, %7 in 1 : vector<16x128xbf16>, vector<16x128xbf16> -> vector<16x256xbf16>
    %c0_11 = arith.constant 0 : index
    %c0_12 = arith.constant 0 : index
    %9 = vector.load %arg4[%c0_11, %c0_12] : memref<896x128xbf16, #tpu.memory_space<vmem>>, vector<256x128xbf16>
    %cst = arith.constant dense<0.000000e+00> : vector<16x128xf32>
    %10 = tpu.matmul %8, %9, %cst {dimension_numbers = #tpu.dot_dimension_numbers<[1], [0], [0], [1], [0, 0, 1, 1], [], []>} : vector<16x256xbf16>, vector<256x128xbf16>, vector<16x128xf32> -> vector<16x128xf32>
    %c2 = arith.constant 2 : index
    %c0_13 = arith.constant 0 : index
    %11 = vector.load %arg9[%c2, %c0_13] : memref<32x128xbf16, #tpu.memory_space<vmem>>, vector<16x128xbf16>
    %c3 = arith.constant 3 : index
    %c0_14 = arith.constant 0 : index
    %12 = vector.load %arg9[%c3, %c0_14] : memref<32x128xbf16, #tpu.memory_space<vmem>>, vector<16x128xbf16>
    %13 = tpu.concatenate %11, %12 in 1 : vector<16x128xbf16>, vector<16x128xbf16> -> vector<16x256xbf16>
    %c256 = arith.constant 256 : index
    %c0_15 = arith.constant 0 : index
    %14 = vector.load %arg4[%c256, %c0_15] : memref<896x128xbf16, #tpu.memory_space<vmem>>, vector<256x128xbf16>
    %cst_16 = arith.constant dense<0.000000e+00> : vector<16x128xf32>
    %15 = tpu.matmul %13, %14, %cst_16 {dimension_numbers = #tpu.dot_dimension_numbers<[1], [0], [0], [1], [0, 0, 1, 1], [], []>} : vector<16x256xbf16>, vector<256x128xbf16>, vector<16x128xf32> -> vector<16x128xf32>
    %16 = arith.addf %10, %15 : vector<16x128xf32>
    %c4 = arith.constant 4 : index
    %c0_17 = arith.constant 0 : index
    %17 = vector.load %arg9[%c4, %c0_17] : memref<32x128xbf16, #tpu.memory_space<vmem>>, vector<16x128xbf16>
    %c5 = arith.constant 5 : index
    %c0_18 = arith.constant 0 : index
    %18 = vector.load %arg9[%c5, %c0_18] : memref<32x128xbf16, #tpu.memory_space<vmem>>, vector<16x128xbf16>
    %19 = tpu.concatenate %17, %18 in 1 : vector<16x128xbf16>, vector<16x128xbf16> -> vector<16x256xbf16>
    %c512 = arith.constant 512 : index
    %c0_19 = arith.constant 0 : index
    %20 = vector.load %arg4[%c512, %c0_19] : memref<896x128xbf16, #tpu.memory_space<vmem>>, vector<256x128xbf16>
    %cst_20 = arith.constant dense<0.000000e+00> : vector<16x128xf32>
    %21 = tpu.matmul %19, %20, %cst_20 {dimension_numbers = #tpu.dot_dimension_numbers<[1], [0], [0], [1], [0, 0, 1, 1], [], []>} : vector<16x256xbf16>, vector<256x128xbf16>, vector<16x128xf32> -> vector<16x128xf32>
    %22 = arith.addf %16, %21 : vector<16x128xf32>
    %c6 = arith.constant 6 : index
    %c0_21 = arith.constant 0 : index
    %23 = vector.load %arg9[%c6, %c0_21] : memref<32x128xbf16, #tpu.memory_space<vmem>>, vector<16x128xbf16>
    %c768 = arith.constant 768 : index
    %c0_22 = arith.constant 0 : index
    %24 = vector.load %arg4[%c768, %c0_22] : memref<896x128xbf16, #tpu.memory_space<vmem>>, vector<128x128xbf16>
    %cst_23 = arith.constant dense<0.000000e+00> : vector<16x128xf32>
    %25 = tpu.matmul %23, %24, %cst_23 {dimension_numbers = #tpu.dot_dimension_numbers<[1], [0], [0], [1], [0, 0, 1, 1], [], []>} : vector<16x128xbf16>, vector<128x128xbf16>, vector<16x128xf32> -> vector<16x128xf32>
    %26 = arith.addf %22, %25 : vector<16x128xf32>
    %c0_24 = arith.constant 0 : index
    %c0_25 = arith.constant 0 : index
    %27 = vector.load %arg5[%c0_24, %c0_25] : memref<1x128xf32, #tpu.memory_space<vmem>>, vector<1x128xf32>
    %28 = vector.broadcast %27 : vector<1x128xf32> to vector<16x128xf32>
    %29 = arith.addf %26, %28 : vector<16x128xf32>
    %cst_26 = arith.constant 0.000000e+00 : f32
    %30 = vector.broadcast %cst_26 : f32 to vector<16x128xf32>
    %31 = arith.cmpf ogt, %29, %30 : vector<16x128xf32>
    %32 = math.exp %29 : vector<16x128xf32>
    %cst_27 = arith.constant 1.000000e+00 : f32
    %33 = vector.broadcast %cst_27 : f32 to vector<16x128xf32>
    %34 = arith.subf %32, %33 : vector<16x128xf32>
    %35 = arith.select %31, %29, %34 : vector<16x128xi1>, vector<16x128xf32>
    %36 = arith.truncf %35 : vector<16x128xf32> to vector<16x128xbf16>
    %c0_28 = arith.constant 0 : index
    %c0_29 = arith.constant 0 : index
    %37 = vector.load %arg6[%c0_28, %c0_29] : memref<128x128xbf16, #tpu.memory_space<vmem>>, vector<128x128xbf16>
    %cst_30 = arith.constant dense<0.000000e+00> : vector<16x128xf32>
    %38 = tpu.matmul %36, %37, %cst_30 {dimension_numbers = #tpu.dot_dimension_numbers<[1], [0], [0], [1], [0, 0, 1, 1], [], []>} : vector<16x128xbf16>, vector<128x128xbf16>, vector<16x128xf32> -> vector<16x128xf32>
    %c0_31 = arith.constant 0 : index
    %c0_32 = arith.constant 0 : index
    %39 = vector.load %arg7[%c0_31, %c0_32] : memref<1x128xf32, #tpu.memory_space<vmem>>, vector<1x128xf32>
    %40 = vector.broadcast %39 : vector<1x128xf32> to vector<16x128xf32>
    %41 = arith.addf %38, %40 : vector<16x128xf32>
    %c3_33 = arith.constant 3 : index
    %c0_34 = arith.constant 0 : index
    %42 = vector.load %arg9[%c3_33, %c0_34] : memref<32x128xbf16, #tpu.memory_space<vmem>>, vector<16x128xbf16>
    %43 = arith.truncf %41 : vector<16x128xf32> to vector<16x128xbf16>
    %44 = arith.addf %43, %42 : vector<16x128xbf16>
    %cst_35 = arith.constant 0.000000e+00 : bf16
    %45 = vector.broadcast %cst_35 : bf16 to vector<16x128xbf16>
    %46 = arith.cmpf ogt, %44, %45 : vector<16x128xbf16>
    %47 = math.exp %44 : vector<16x128xbf16>
    %cst_36 = arith.constant 1.000000e+00 : bf16
    %48 = vector.broadcast %cst_36 : bf16 to vector<16x128xbf16>
    %49 = arith.subf %47, %48 : vector<16x128xbf16>
    %50 = arith.select %46, %44, %49 : vector<16x128xi1>, vector<16x128xbf16>
    %c0_37 = arith.constant 0 : index
    %c0_38 = arith.constant 0 : index
    %c0_39 = arith.constant 0 : index
    %51 = vector.load %arg8[%c0_37, %c0_38, %c0_39] : memref<1x16x128xbf16, #tpu.memory_space<vmem>>, vector<1x16x128xbf16>
    %52 = vector.shape_cast %51 : vector<1x16x128xbf16> to vector<16x128xbf16>
    %53 = vector.shape_cast %50 : vector<16x128xbf16> to vector<1x16x128xbf16>
    tpu.vector_store %arg8[%c0_37, %c0_38, %c0_39], %53 {strides = array<i32>} : memref<1x16x128xbf16, #tpu.memory_space<vmem>>, vector<1x16x128xbf16>,
    return
  }
  func.func @transform_0(%arg0: i32, %arg1: i32) -> (i32, i32, i32) {
    %c0_i32 = arith.constant 0 : i32
    %c0_i32_0 = arith.constant 0 : i32
    return %arg0, %arg1, %c0_i32 : i32, i32, i32
  }
  func.func @transform_1(%arg0: i32, %arg1: i32) -> (i32, i32, i32) {
    %c1_i32 = arith.constant 1 : i32
    %0 = arith.addi %arg1, %c1_i32 : i32
    %c1_i32_0 = arith.constant 1 : i32
    %1 = arith.muli %0, %c1_i32_0 : i32
    %c0_i32 = arith.constant 0 : i32
    %c0_i32_1 = arith.constant 0 : i32
    return %arg0, %1, %c0_i32 : i32, i32, i32
  }
  func.func @transform_2(%arg0: i32, %arg1: i32) -> (i32, i32) {
    %c0_i32 = arith.constant 0 : i32
    %c0_i32_0 = arith.constant 0 : i32
    %c0_i32_1 = arith.constant 0 : i32
    return %c0_i32, %c0_i32_0 : i32, i32
  }
  func.func @transform_3(%arg0: i32, %arg1: i32) -> (i32, i32) {
    %c0_i32 = arith.constant 0 : i32
    %c0_i32_0 = arith.constant 0 : i32
    %c0_i32_1 = arith.constant 0 : i32
    return %c0_i32, %c0_i32_0 : i32, i32
  }
  func.func @transform_4(%arg0: i32, %arg1: i32) -> (i32, i32) {
    %c0_i32 = arith.constant 0 : i32
    %c0_i32_0 = arith.constant 0 : i32
    %c0_i32_1 = arith.constant 0 : i32
    return %c0_i32, %c0_i32_0 : i32, i32
  }
  func.func @transform_5(%arg0: i32, %arg1: i32) -> (i32, i32) {
    %c0_i32 = arith.constant 0 : i32
    %c0_i32_0 = arith.constant 0 : i32
    %c0_i32_1 = arith.constant 0 : i32
    return %c0_i32, %c0_i32_0 : i32, i32
  }
  func.func @transform_6(%arg0: i32, %arg1: i32) -> (i32, i32, i32) {
    %c0_i32 = arith.constant 0 : i32
    %c0_i32_0 = arith.constant 0 : i32
    return %arg0, %arg1, %c0_i32 : i32, i32, i32
  }
}

</mosaic_0001>

<bundles_post_ra>
// kernel: resnet1d_pallas.1
= control target key start
LH: loop header
LB: loop body
LE: loop exit
PB: predicated region body
PF: predicated region fallthrough
CT: control target
= control target key end

     0   :  { %s1707_s21 = smov 0   ;;  %s1709_s22 = smov 0   ;;  %s2006_s0 = inlined_call_operand.vmem [shape: bf16[2,32,128], index: 0, kind: input, shape index: {}, may-alias: {0,1}]   ;;  %s2007_s1 = inlined_call_operand.vmem [shape: bf16[2,32,128], index: 1, kind: input, shape index: {}, may-alias: {0,1}]   ;;  %s2008_s2 = inlined_call_operand.vmem [shape: bf16[896,128], index: 2, kind: input, shape index: {}]   ;;  %s2009_s3 = inlined_call_operand.vmem [shape: f32[1,128], index: 3, kind: input, shape index: {}]   ;;  %s2010_s4 = inlined_call_operand.vmem [shape: bf16[128,128], index: 4, kind: input, shape index: {}]   ;;  %s2011_s5 = inlined_call_operand.vmem [shape: f32[1,128], index: 5, kind: input, shape index: {}]   ;;  %s2012_s6 = inlined_call_operand.vmem [shape: bf16[2,16,128], index: 6, kind: output, shape index: {}]  }
   0x1   :  { %s1711_s23 = smov 0  }
   0x2 LB: > { %s28_s24 = sadd.s32 1, %s1663_s22  ;;  %p1326_p0 = scmp.ge.s32.totalorder %s1667_s23, 1  ;;  %s1667_s23 = sphi %s1711_s23, %s16_s23   ;;  %s1663_s22 = sphi %s1709_s22, %s2014_s22   ;;  %s1659_s21 = sphi %s1707_s21, %s2013_s21  }
   0x3   : > { %p30_p1 = scmp.ge.s32.totalorder %s28_s24, 2  ;;  %p254_p2 = scmp.lt.s32.totalorder %s1667_s23, 3 }
   0x5   : > { %s2016_s24 = smov (%p30_p1, %s28_s24), 0  ;;  %p255_p3 = pnand %p1326_p0, %p254_p2 }
   0x6   : > { %p303_p4 = scmp.lt.s32.totalorder (!%p255_p3), %s1659_s21, 1 }
   0x7   : > { %258 = sbr.rel (%p255_p3) target bundleno = 532 (0x214), region = 44 }
   0xc   : > { %v1568_v0 = vld [vmem:[%s2008_s2 + $0xf8] sm:$0xff]   ;;  %v1572_v4 = vld [vmem:[%s2008_s2 + $0xf0] sm:$0xff]   ;;  %v1576_v8 = vld [vmem:[%s2008_s2 + $0xe8] sm:$0xff]   ;;  %s2018_s21 = smov (!%p303_p4, %s1659_s21), 1  ;;  %v1669_v35 = vmov 0.0   ;;  %vm457_vm1 = vcmask 1046528  }
   0xd   : > { %v1569_v1 = vld [vmem:[%s2008_s2 + $0x78] sm:$0xff]   ;;  %1417 = vmatprep.subr.bf16.mxu0 %v1568_v0  ;;  %v1573_v5 = vld [vmem:[%s2008_s2 + $0x70] sm:$0xff]   ;;  %v1577_v9 = vld [vmem:[%s2008_s2 + $0x68] sm:$0xff]   ;;  %s1412_s9 = sshll.u32 %s2018_s21, 4  ;;  %vm356_vm0 = vsmask.f32 7424 }
   0xe   : > { %v1570_v2 = vld [vmem:[%s2008_s2 + $0xb8] sm:$0xff]   ;;  %1439 = vmatprep.subr.bf16.mxu1 %v1569_v1  ;;  %v1574_v6 = vld [vmem:[%s2008_s2 + $0xb0] sm:$0xff]   ;;  %v1578_v10 = vld [vmem:[%s2008_s2 + $0xa8] sm:$0xff]   ;;  %s1414_s16 = sadd.s32 8, %s1412_s9  ;;  %s310_s29 = scalar_lea.vmem %s2006_s0, %s1412_s9  ;;  %vm1670_vm2 = vmmov 0   ;;  %vm795_vm3 = vcmask 1045504  }
   0xf   : > { %v1571_v3 = vld [vmem:[%s2008_s2 + $0x38] sm:$0xff]   ;;  %1418 = vmatpush3.bf16.msra.mxu0 %v1570_v2  ;;  %v1575_v7 = vld [vmem:[%s2008_s2 + $0x30] sm:$0xff]   ;;  %v1579_v11 = vld [vmem:[%s2008_s2 + $0x28] sm:$0xff]   ;;  %s321_s8 = scalar_lea.vmem %s2007_s1, %s1414_s16  ;;  %vm963_vm4 = vcmask 1044480   ;;  %vm1192_vm7 = vsmask.f32 6400 }
  0x10   : > { %1440 = vmatpush3.bf16.msra.mxu1 %v1571_v3  ;;  %1419 = vmatprep.subr.bf16.mxu0 %v1572_v4  ;;  %v1580_v12 = vld [vmem:[%s2008_s2 + $0xe0] sm:$0xff]   ;;  %v1584_v16 = vld [vmem:[%s2008_s2 + $0xd8] sm:$0xff]   ;;  %v1588_v20 = vld [vmem:[%s2008_s2 + $0xd0] sm:$0xff]   ;;  %s1415_s25 = sshll.u32 %s2018_s21, 3 }
  0x11   : > { %1441 = vmatprep.subr.bf16.mxu1 %v1573_v5  ;;  %v1581_v13 = vld [vmem:[%s2008_s2 + $0x60] sm:$0xff]   ;;  %v1585_v17 = vld [vmem:[%s2008_s2 + $0x58] sm:$0xff]   ;;  %v1589_v21 = vld [vmem:[%s2008_s2 + $0x50] sm:$0xff]   ;;  %s332_s28 = scalar_lea.vmem %s2012_s6, %s1415_s25 }
  0x12   : > { %v1582_v14 = vld [vmem:[%s2008_s2 + $0xa0] sm:$0xff]   ;;  %v1586_v18 = vld [vmem:[%s2008_s2 + $0x98] sm:$0xff]   ;;  %v1590_v22 = vld [vmem:[%s2008_s2 + $0x90] sm:$0xff]  }
  0x13   : > { %1420 = vmatpush3.bf16.msra.mxu0 %v1574_v6  ;;  %v1583_v15 = vld [vmem:[%s2008_s2 + $0x20] sm:$0xff]   ;;  %v1587_v19 = vld [vmem:[%s2008_s2 + $0x18] sm:$0xff]   ;;  %v1591_v23 = vld [vmem:[%s2008_s2 + $0x10] sm:$0xff]  }
  0x14   : > { %1442 = vmatpush3.bf16.msra.mxu1 %v1575_v7  ;;  %1421 = vmatprep.subr.bf16.mxu0 %v1576_v8  ;;  %v1592_v24 = vld [vmem:[%s2008_s2 + $0xc8] sm:$0xff]   ;;  %v1596_v28 = vld [vmem:[%s2008_s2 + $0xc0] sm:$0xff]   ;;  %v1604_v34 = vld [vmem:[%s2008_s2 + $0x178] sm:$0xff]  }
  0x15   : > { %1443 = vmatprep.subr.bf16.mxu1 %v1577_v9  ;;  %v1593_v25 = vld [vmem:[%s2008_s2 + $0x48] sm:$0xff]   ;;  %v1597_v29 = vld [vmem:[%s2008_s2 + $0x40] sm:$0xff]   ;;  %v1606_v61 = vld [vmem:[%s2008_s2 + $0x1b8] sm:$0xff]  }
  0x16   : > { %v1594_v26 = vld [vmem:[%s2008_s2 + $0x88] sm:$0xff]   ;;  %v1598_v30 = vld [vmem:[%s2008_s2 + $0x80] sm:$0xff]   ;;  %v1605_v1 = vld [vmem:[%s2008_s2 + $0x138] sm:$0xff]  }
  0x17   : > { %1422 = vmatpush3.bf16.msra.mxu0 %v1578_v10  ;;  %v1595_v27 = vld [vmem:[%s2008_s2 + $0x8] sm:$0xff]   ;;  %v1599_v31 = vld [vmem:[%s2008_s2] sm:$0xff]   ;;  %v1607_v3 = vld [vmem:[%s2008_s2 + $0x170] sm:$0xff]  }
  0x18   : > { %1444 = vmatpush3.bf16.msra.mxu1 %v1579_v11  ;;  %1423 = vmatprep.subr.bf16.mxu0 %v1580_v12  ;;  %v336_v32 = vld [vmem:[%s310_s29] sm:$0xff]   ;;  %v1609_v4 = vld [vmem:[%s2008_s2 + $0x1b0] sm:$0xff]   ;;  %v1610_v6 = vld [vmem:[%s2008_s2 + $0x168] sm:$0xff]  }
  0x19   : > { %1445 = vmatprep.subr.bf16.mxu1 %v1581_v13  ;;  %v340_v33 = vld [vmem:[%s321_s8] sm:$0xff]   ;;  %338 = vst [vmem:[#allocation2] sm:$0xff] %v336_v32   ;;  %v1608_v5 = vld [vmem:[%s2008_s2 + $0x130] sm:$0xff]   ;;  %v1612_v7 = vld [vmem:[%s2008_s2 + $0x1a8] sm:$0xff]  }
  0x1a   : > { %342 = vst [vmem:[#allocation2 + $0x8] sm:$0xff] %v340_v33   ;;  %v1611_v8 = vld [vmem:[%s2008_s2 + $0x128] sm:$0xff]   ;;  %v1613_v9 = vld [vmem:[%s2008_s2 + $0x160] sm:$0xff]   ;;  %v1616_v13 = vld [vmem:[%s2008_s2 + $0x158] sm:$0xff]  }
  0x1b   : > { %1424 = vmatpush3.bf16.msra.mxu0 %v1582_v14  ;;  %v1615_v10 = vld [vmem:[%s2008_s2 + $0x1a0] sm:$0xff]   ;;  %v1622_v33 = vld [vmem:[%s2008_s2 + $0x148] sm:$0xff]  }
  0x1c   : > { %1446 = vmatpush3.bf16.msra.mxu1 %v1583_v15  ;;  %1425 = vmatprep.subr.bf16.mxu0 %v1584_v16  ;;  %v1614_v12 = vld [vmem:[%s2008_s2 + $0x120] sm:$0xff]  }
  0x1d   : > { %1447 = vmatprep.subr.bf16.mxu1 %v1585_v17 }
  0x1f   : > { %1426 = vmatpush3.bf16.msra.mxu0 %v1586_v18 }
  0x20   : > { %1448 = vmatpush3.bf16.msra.mxu1 %v1587_v19  ;;  %1427 = vmatprep.subr.bf16.mxu0 %v1588_v20  ;;  %v1838_v36 = vld [vmem:[#allocation2 + $0x4] sm:$0xf]  ;;  %v402_v37 = vld [vmem:[#allocation2] sm:$0xe]  ;;  %v1617_v20 = vld [vmem:[%s2008_s2 + $0x118] sm:$0xff]  }
  0x21   : > { %1449 = vmatprep.subr.bf16.mxu1 %v1589_v21  ;;  %v1841_v38 = vcombine.low %v402_v37, %v1838_v36  ;;  %v1843_v39 = vld [vmem:[#allocation2 + $0x8] ss:$0 sps:$4 sm:$0x33]   ;;  %v344_v40 = vld [vmem:[#allocation2] sm:$0xf]  ;;  %v1618_v21 = vld [vmem:[%s2008_s2 + $0x198] sm:$0xff]  }
  0x22   : > { %v1333_v41 = vcombine.low %v344_v40, %v1838_v36  ;;  %v1603_v42 = vld [vmem:[#allocation2 + $0x8] ss:$0 sps:$4 sm:$0x11]   ;;  %v418_v45 = vshll.u32 %v1843_v39, 16  ;;  %v422_v46 = vshrl.u32 %v1843_v39, 16 }
  0x23   : > { %1428 = vmatpush3.bf16.msra.mxu0 %v1590_v22  ;;  %v411_v43 = vshrl.u32 %v1841_v38, 16  ;;  %v413_v44 = vshll.u32 %v1841_v38, 16  ;;  %v365_v49 = vshll.u32 %v1603_v42, 16  ;;  %v458_v54 = vrot.slane %v1841_v38, 1  ;;  %v740_v11 = vld [vmem:[#allocation2] sm:$0xc] }
  0x24   : > { %1450 = vmatpush3.bf16.msra.mxu1 %v1591_v23  ;;  %1429 = vmatprep.subr.bf16.mxu0 %v1592_v24  ;;  %v358_v47 = vshrl.u32 %v1333_v41, 16  ;;  %v360_v48 = vshll.u32 %v1333_v41, 16  ;;  %v420_v51 = vrot.slane %v418_v45, 1  ;;  %v459_v55 = vrot.slane %v1603_v42, 1  ;;  %v1619_v22 = vld [vmem:[%s2008_s2 + $0x150] sm:$0xff]   ;;  %v1625_v42 = vld [vmem:[%s2008_s2 + $0x140] sm:$0xff]  }
  0x25   : > { %1451 = vmatprep.subr.bf16.mxu1 %v1593_v25  ;;  %v415_v50 = vrot.slane %v413_v44, 1  ;;  %v367_v53 = vrot.slane %v365_v49, 1  ;;  %v1369_v14 = vcombine.low %v740_v11, %v1838_v36  ;;  %v1629_v15 = vld [vmem:[#allocation2 + $0x8] ss:$0 sps:$4 sm:$0x77]   ;;  %v1621_v25 = vld [vmem:[%s2008_s2 + $0x190] sm:$0xff]  }
  0x26   : > { %v362_v52 = vrot.slane %v360_v48, 1  ;;  %v424_v57 = vor.u32 %v422_v46, %v420_v51  ;;  %v460_v0 = vsel %vm457_vm1, %v458_v54, %v459_v55  ;;  %v756_v18 = vshll.u32 %v1629_v15, 16  ;;  %v1626_v49 = vld [vmem:[%s2008_s2 + $0x100] sm:$0xff]   ;;  %v1631_v54 = vld [vmem:[%s2010_s4 + $0x38] sm:$0xff]   ;;  %v1632_v55 = vld [vmem:[%s2010_s4 + $0x30] sm:$0xff]  }
  0x27   : > { %1430 = vmatpush3.bf16.msra.mxu0 %v1594_v26  ;;  %v416_v56 = vor.u32 %v415_v50, %v411_v43  ;;  %v749_v16 = vshrl.u32 %v1369_v14, 16  ;;  %v751_v17 = vshll.u32 %v1369_v14, 16  ;;  %v760_v19 = vshrl.u32 %v1629_v15, 16 }
  0x28   : > { %1452 = vmatpush3.bf16.msra.mxu1 %v1595_v27  ;;  %1431 = vmatprep.subr.bf16.mxu0 %v1596_v28  ;;  %v363_v58 = vor.u32 %v362_v52, %v358_v47  ;;  %v462_v60 = vrot.slane %v424_v57, 1  ;;  %v758_v24 = vrot.slane %v756_v18, 1  ;;  %v1627_v47 = vld [vmem:[%s2008_s2 + $0x180] sm:$0xff]   ;;  %v796_v50 = vrot.slane %v1369_v14, 2 }
  0x29   : > { %1453 = vmatprep.subr.bf16.mxu1 %v1597_v29  ;;  %v421_v59 = vsel %vm356_vm0, %v416_v56, %v420_v51  ;;  %v753_v23 = vrot.slane %v751_v17, 1  ;;  %v797_v51 = vrot.slane %v1843_v39, 2  ;;  %v1633_v56 = vld [vmem:[%s2010_s4 + $0x28] sm:$0xff]   ;;  %v1634_v57 = vld [vmem:[%s2010_s4 + $0x20] sm:$0xff]  }
  0x2a   : > { %v461_v62 = vrot.slane %v421_v59, 1  ;;  %v368_v63 = vsel %vm356_vm0, %v363_v58, %v367_v53  ;;  %v762_v27 = vor.u32 %v760_v19, %v758_v24  ;;  %v1635_v58 = vld [vmem:[%s2010_s4 + $0x18] sm:$0xff]   ;;  %v1636_v59 = vld [vmem:[%s2010_s4 + $0x10] sm:$0xff]   ;;  %v1396_v19 = vld [vmem:[%s2009_s3] ss:$0 sm:$0xff] }
  0x2b   : > { %1432 = vmatpush3.bf16.msra.mxu0 %v1598_v30  ;;  %731 = vmatprep.mubr.bf16.mxu1 %v368_v63  ;;  %v754_v26 = vor.u32 %v753_v23, %v749_v16  ;;  %v943_v30 = vld [vmem:[#allocation2] sm:$0x8]  ;;  %v798_v53 = vsel %vm795_vm3, %v796_v50, %v797_v51  ;;  %v1399_v50 = vld [vmem:[%s2011_s5] ss:$0 sm:$0xff] }
  0x2c   : > { %1454 = vmatpush3.bf16.msra.mxu1 %v1599_v31  ;;  %1461 = vmatprep.subr.bf16.mxu0 %v1604_v34  ;;  %v463_v2 = vsel %vm457_vm1, %v461_v62, %v462_v60  ;;  %v800_v29 = vrot.slane %v762_v27, 2  ;;  %v1620_v31 = vld [vmem:[%s2008_s2 + $0x110] sm:$0xff]   ;;  %v1624_v34 = vld [vmem:[%s2008_s2 + $0x188] sm:$0xff]   ;;  %v1387_v40 = vcombine.low %v943_v30, %v1838_v36  ;;  %v965_v36 = vrot.slane %v1629_v15, 3 }
  0x2d   : > { %1501 = vmatprep.subr.bf16.mxu1 %v1669_v35  ;;  %594 = vmatprep.mubr.bf16.mxu0 %v463_v2  ;;  %v759_v28 = vsel %vm356_vm0, %v754_v26, %v758_v24  ;;  %v1637_v60 = vld [vmem:[%s2010_s4 + $0x8] sm:$0xff]  }
  0x2e   : > { %595 = vmatmul.mubr.bf16.vlgmr.msra.gmra.mxu0 %v460_v0  ;;  %v799_v32 = vrot.slane %v759_v28, 2  ;;  %v964_v48 = vrot.slane %v1387_v40, 3 }
  0x2f   : > { %732 = vmatmul.mubr.bf16.vlgmr.msra.gmra.mxu1 %v1333_v41  ;;  %1462 = vmatpush3.bf16.msra.mxu0 %v1605_v1  ;;  %v1623_v41 = vld [vmem:[%s2008_s2 + $0x108] sm:$0xff]  }
  0x30   : > { %1502 = vmatpush3.bf16.msra.mxu1 %v1606_v61  ;;  %1517 = vmatprep.mubr.msk.bf16.mxu1 %vm1670_vm2, %v1669_v35  ;;  %v801_v37 = vsel %vm795_vm3, %v799_v32, %v800_v29  ;;  %v966_v52 = vsel %vm963_vm4, %v964_v48, %v965_v36  ;;  %v1638_v61 = vld [vmem:[%s2010_s4] sm:$0xff]   ;;  %v1193_v48 = vrot.slane %v411_v43, 1  ;;  %v1194_v36 = vrot.slane %v413_v44, 2 }
  0x31   : > { %1503 = vmatprep.subr.bf16.mxu1 %v1669_v35  ;;  %1463 = vmatprep.subr.bf16.mxu0 %v1607_v3  ;;  %v1671_v44 = vmov 1065369472  }
  0x32   : > { %932 = vmatprep.mubr.bf16.mxu0 %v801_v37 }
  0x33   : > { %1464 = vmatpush3.bf16.msra.mxu0 %v1608_v5 }
  0x34   : > { %1504 = vmatpush3.bf16.msra.mxu1 %v1609_v4  ;;  %1465 = vmatprep.subr.bf16.mxu0 %v1610_v6 }
  0x35   : > { %1505 = vmatprep.subr.bf16.mxu1 %v1669_v35 }
  0x37   : > { %1466 = vmatpush3.bf16.msra.mxu0 %v1611_v8 }
  0x38   : > { %1506 = vmatpush3.bf16.msra.mxu1 %v1612_v7  ;;  %1467 = vmatprep.subr.bf16.mxu0 %v1613_v9 }
  0x39   : > { %1507 = vmatprep.subr.bf16.mxu1 %v1669_v35 }
  0x3b   : > { %1468 = vmatpush3.bf16.msra.mxu0 %v1614_v12 }
  0x3c   : > { %1508 = vmatpush3.bf16.msra.mxu1 %v1615_v10  ;;  %1469 = vmatprep.subr.bf16.mxu0 %v1616_v13 }
  0x3d   : > { %1509 = vmatprep.subr.bf16.mxu1 %v1669_v35 }
  0x3f   : > { %1470 = vmatpush3.bf16.msra.mxu0 %v1617_v20 }
  0x40   : > { %1510 = vmatpush3.bf16.msra.mxu1 %v1618_v21  ;;  %1471 = vmatprep.subr.bf16.mxu0 %v1619_v22 }
  0x41   : > { %1511 = vmatprep.subr.bf16.mxu1 %v1669_v35 }
  0x43   : > { %1472 = vmatpush3.bf16.msra.mxu0 %v1620_v31 }
  0x44   : > { %1512 = vmatpush3.bf16.msra.mxu1 %v1621_v25  ;;  %1473 = vmatprep.subr.bf16.mxu0 %v1622_v33 }
  0x45   : > { %1513 = vmatprep.subr.bf16.mxu1 %v1669_v35 }
  0x47   : > { %1474 = vmatpush3.bf16.msra.mxu0 %v1623_v41  ;;  %v1196_v41 = vrot.slane %v422_v46, 1 }
  0x48   : > { %1514 = vmatpush3.bf16.msra.mxu1 %v1624_v34  ;;  %1475 = vmatprep.subr.bf16.mxu0 %v1625_v42  ;;  %v1197_v42 = vrot.slane %v418_v45, 2 }
  0x49   : > { %1515 = vmatprep.subr.bf16.mxu1 %v1669_v35 }
  0x4b   : > { %1476 = vmatpush3.bf16.msra.mxu0 %v1626_v49 }
  0x4c   : > { %1516 = vmatpush3.bf16.msra.mxu1 %v1627_v47  ;;  %1521 = vmatprep.subr.bf16.mxu0 %v1669_v35  ;;  %v1198_v47 = vor.u32 %v1197_v42, %v1196_v41 }
  0x4e   : > { %933 = vmatmul.mubr.bf16.vlgmr.msra.gmra.mxu0 %v798_v53 }
  0x4f   : > { %1518 = vmatmul.mubr.bf16.vlgmr.msra.gmra.mxu1 %v966_v52  ;;  %1537 = vmatprep.mubr.msk.bf16.mxu0 %vm1670_vm2, %v1669_v35  ;;  %v1195_v52 = vor.u32 %v1194_v36, %v1193_v48 }
  0x50   : > { %1522 = vmatpush3.bf16.msra.mxu0 %v1631_v54 }
  0x51   : > { %1523 = vmatprep.subr.bf16.mxu0 %v1669_v35  ;;  %v1199_v45 = vsel %vm1192_vm7, %v1195_v52, %v1198_v47 }
  0x54   : > { %1524 = vmatpush3.bf16.msra.mxu0 %v1632_v55 }
  0x55   : > { %1525 = vmatprep.subr.bf16.mxu0 %v1669_v35 }
  0x58   : > { %1526 = vmatpush3.bf16.msra.mxu0 %v1633_v56 }
  0x59   : > { %1527 = vmatprep.subr.bf16.mxu0 %v1669_v35 }
  0x5c   : > { %1528 = vmatpush3.bf16.msra.mxu0 %v1634_v57 }
  0x5d   : > { %1529 = vmatprep.subr.bf16.mxu0 %v1669_v35 }
  0x60   : > { %1530 = vmatpush3.bf16.msra.mxu0 %v1635_v58 }
  0x61   : > { %1531 = vmatprep.subr.bf16.mxu0 %v1669_v35 }
  0x64   : > { %1532 = vmatpush3.bf16.msra.mxu0 %v1636_v59 }
  0x65   : > { %1533 = vmatprep.subr.bf16.mxu0 %v1669_v35 }
  0x68   : > { %1534 = vmatpush3.bf16.msra.mxu0 %v1637_v60 }
  0x69   : > { %1535 = vmatprep.subr.bf16.mxu0 %v1669_v35 }
  0x6c   : > { %1536 = vmatpush3.bf16.msra.mxu0 %v1638_v61 }
  0xee   : > { %v1433_v63 = vpop.f32.mrf.mxu0 }
  0xef   : > { %v1455_v62 = vpop.f32.mrf.mxu1 }
  0xf0   : > { %v1434_v1 = vpop.f32.mrf.mxu0 }
  0xf1   : > { %v1456_v0 = vpop.f32.mrf.mxu1  ;;  %v1435_v7 = vadd.f32 %v1434_v1, %v1433_v63 }
  0xf2   : > { %v1436_v3 = vpop.f32.mrf.mxu0  ;;  %v1457_v8 = vadd.f32 %v1456_v0, %v1455_v62 }
  0xf3   : > { %v1458_v2 = vpop.f32.mrf.mxu1 }
  0xf4   : > { %v1437_v5 = vpop.f32.mrf.mxu0  ;;  %v734_v13 = vadd.f32 %v1457_v8, %v1435_v7 }
  0xf5   : > { %v1459_v4 = vpop.f32.mrf.mxu1  ;;  %v1438_v14 = vadd.f32 %v1437_v5, %v1436_v3 }
  0xf6   : > { %v1460_v15 = vadd.f32 %v1459_v4, %v1458_v2 }
  0xf8   : > { %v737_v21 = vadd.f32 %v1460_v15, %v1438_v14 }
 0x10e   : > { %v1477_v9 = vpop.f32.mrf.mxu0 }
 0x10f   : > { %v1050_v6 = vpop.f32.mrf.mxu1 }
 0x110   : > { %v1478_v11 = vpop.f32.mrf.mxu0 }
 0x111   : > { %v1519_v10 = vpop.f32.mrf.mxu1  ;;  %v1479_v35 = vadd.f32 %v1478_v11, %v1477_v9 }
 0x112   : > { %v1480_v16 = vpop.f32.mrf.mxu0 }
 0x113   : > { %v1053_v12 = vpop.f32.mrf.mxu1  ;;  %v941_v18 = vadd.f32 %v1479_v35, %v734_v13 }
 0x114   : > { %v1481_v20 = vpop.f32.mrf.mxu0 }
 0x115   : > { %v1520_v17 = vpop.f32.mrf.mxu1  ;;  %v1057_v22 = vadd.f32 %v1050_v6, %v941_v18  ;;  %v1482_v23 = vadd.f32 %v1481_v20, %v1480_v16 }
 0x117   : > { %v1066_v24 = vadd.f32 %v1396_v19, %v1057_v22  ;;  %v942_v25 = vadd.f32 %v1482_v23, %v737_v21 }
 0x119   : > { %v1070_v26 = vmul.f32 1.442695, %v1066_v24  ;;  %v1058_v27 = vadd.f32 %v1053_v12, %v942_v25  ;;  %vm1068_vm5 = vcmp.gt.f32.partialorder %v1066_v24, 0.0 }
 0x11b   : > { %1639 = vpow2.f32 %v1070_v26  ;;  %v1067_v28 = vadd.f32 %v1396_v19, %v1058_v27 }
 0x11d   : > { %v1072_v29 = vmul.f32 1.442695, %v1067_v28  ;;  %vm1069_vm6 = vcmp.gt.f32.partialorder %v1067_v28, 0.0 }
 0x11f   : > { %1641 = vpow2.f32 %v1072_v29 }
 0x128   : > { %v1640_v30 = vpop.eup %1639 }
 0x129   : > { %v1397_v31 = vadd.f32 -1.0, %v1640_v30 }
 0x12b   : > { %v1076_v34 = vsel %vm1068_vm5, %v1066_v24, %v1397_v31 }
 0x12c   : > { %v1642_v32 = vpop.eup %1641 }
 0x12d   : > { %v1398_v33 = vadd.f32 -1.0, %v1642_v32 }
 0x12f   : > { %v1077_v37 = vsel %vm1069_vm6, %v1067_v28, %v1398_v33 }
 0x130   : > { %v1078_v40 = vpack.c.bf16 %v1077_v37, %v1076_v34 }
 0x132   : > { %1538 = vmatmul.mubr.bf16.vlgmr.msra.gmra.mxu0 %v1078_v40 }
 0x1f2   : > { %v1184_v49 = vpop.f32.mrf.mxu0 }
 0x1f3   : > { %v1185_v53 = vadd.f32 %v1399_v50, %v1184_v49 }
 0x1f4   : > { %v1539_v51 = vpop.f32.mrf.mxu0 }
 0x1f6   : > { %v1187_v46 = vpop.f32.mrf.mxu0 }
 0x1f7   : > { %v1188_v39 = vadd.f32 %v1399_v50, %v1187_v46 }
 0x1f8   : > { %v1540_v54 = vpop.f32.mrf.mxu0 }
 0x1f9   : > { %v1191_v55 = vpack.c.bf16 %v1188_v39, %v1185_v53 }
 0x1fb   : > { %v1201_v56 = vadd.bf16 %v1199_v45, %v1191_v55 }
 0x1fd   : > { %v1204_v43 = vmul.bf16 1069105081, %v1201_v56  ;;  %vm1202_vm8 = vcmp.gt.bf16.partialorder %v1201_v56, 0 }
 0x1ff   : > { %1643 = vpow.bf16 %v1204_v43 }
 0x20d   : > { %v1644_v38 = vpop.eup %1643 }
 0x20e   : > { %v1206_v57 = vsub.bf16 %v1644_v38, %v1671_v44 }
 0x210   : > { %v1207_v58 = vsel %vm1202_vm8, %v1201_v56, %v1206_v57 }
 0x211   : > { %v1408_v59 = vcombine.low %v1207_v58, %v1207_v58  ;;  %v1409_v60 = vcombine.high %v1207_v58, %v1207_v58 }
 0x213   : > { %1215 = vst [vmem:[%s332_s28] sm:$0xf] %v1408_v59  ;;  %1216 = vst [vmem:[%s332_s28 + $0x4] sm:$0xf] %v1409_v60 }
 0x214 PF: > { %s16_s23 = sadd.s32 1, %s1667_s23   ;;  %s2013_s21 = smov %s1663_s22 }
 0x215   : > { %p13_p5 = scmp.ge.s32.totalorder %s16_s23, 4   ;;  %s2014_s22 = smov %s2016_s24 }
 0x217   :  { %15 = sbr.rel (!%p13_p5) target bundleno = 2 (0x2), region = 77 }

</bundles_post_ra>
